<compile_context>
chip_gen: v7x
topology: tpu7x:2x2x1
jax: 0.10.0
libtpu: 0.0.40
codegen_flags: <defaults>
</compile_context>

<pallas_src>
import functools

import jax
import jax.numpy as jnp
from jax.experimental import pallas as pl
from jax.experimental.pallas import tpu as pltpu


def _round_up(x: int, m: int) -> int:
    return (x + m - 1) // m * m


def _vmem_cap_bytes() -> int:
    """Per-generation scoped-VMEM cap (3/4 of physical), safe fallback 48 MiB."""
    try:
        cap = int(pltpu.get_tpu_info().vmem_capacity_bytes)
        return max(min(cap * 3 // 4, 96 << 20), 16 << 20)
    except Exception:
        return 48 << 20  # fits v7x's 64 MiB physical VMEM


def _pick_divisor_tile(padded_dim: int, gran: int, max_tile: int) -> int:
    """Largest multiple of `gran` that divides `padded_dim` and is <= max_tile.

    `padded_dim` is already `gran`-aligned, so this never adds padding beyond
    the one-time 128-alignment of the prepared weight (zero tile waste)."""
    if padded_dim <= max_tile:
        return padded_dim
    t = (max_tile // gran) * gran
    while t > gran:
        if padded_dim % t == 0:
            return t
        t -= gran
    return gran


def _pick_m_tile(batch: int, sub: int, max_tm: int) -> int:
    """Batch tile (multiple of `sub`, <= max_tm) minimising (#M blocks, pad rows)."""
    mp_min = _round_up(batch, sub)
    if mp_min <= max_tm:
        return mp_min
    best_key, best_t = None, sub
    t = (max_tm // sub) * sub
    while t >= sub:
        mp = _round_up(batch, t)
        key = (mp // t, mp - batch, -t)
        if best_key is None or key < best_key:
            best_key, best_t = key, t
        t -= sub
    return best_t


def _linear_kernel(x_ref, w_ref, o_ref, acc_ref, *, precision):
    # x_ref: [tm, tk]   w_ref: [tk, tn]  (weight pre-transposed in the wrapper)
    k = pl.program_id(2)
    prod = jnp.dot(
        x_ref[...], w_ref[...],
        preferred_element_type=jnp.float32,
        precision=precision,
    )

    @pl.when(k == 0)
    def _():
        acc_ref[...] = prod          # direct write: no zero-init VPU pass

    @pl.when(k > 0)
    def _():
        acc_ref[...] += prod

    # Cast + store once, on the final K step only.
    @pl.when(k == pl.num_programs(2) - 1)
    def _():
        o_ref[...] = acc_ref[...].astype(o_ref.dtype)


def _padded_linear_matmul(x, w_p, num_out, *, out_dtype, precision,
                          weight_buffers=2):
    """y[:B, :num_out] = x @ w_p[:num_in, :num_out].

    x:   [B, num_in]      activation (cast to w_p.dtype inside)
    w_p: [Kp, Np]         weight, already transposed to [num_in, num_out],
                          cast to the compute dtype and 128-padded.
    """
    B, num_in = x.shape
    Kp, Np = w_p.shape
    compute_dtype = w_p.dtype
    in_bytes = compute_dtype.itemsize
    out_bytes = jnp.dtype(out_dtype).itemsize

    # Sublane granularity: 8 rows for 4-byte, 16 for 2-byte operands.
    sub = max(8, 32 // in_bytes)

    # --- tile selection (problem-aware) -------------------------------------
    small_batch = _round_up(B, sub) <= 512       # one M block -> weight-HBM-bound
    if in_bytes <= 2:
        max_tm, max_tn, max_tk = 512, 512, 1024
        if small_batch:
            max_tn, max_tk = 1024, 2048
    else:
        max_tm, max_tn, max_tk = 512, 512, 512
        if small_batch:
            max_tn, max_tk = 1024, 1024

    tm = _pick_m_tile(B, sub, max_tm)
    Mp = _round_up(B, tm)
    tn = _pick_divisor_tile(Np, 128, max_tn)     # zero extra weight padding
    tk = _pick_divisor_tile(Kp, 128, max_tk)
    gm, gn, gk = Mp // tm, Np // tn, Kp // tk

    # Pad the activation only (cheap, per call); weight is pre-padded.
    x_p = x.astype(compute_dtype)
    if (Mp, Kp) != (B, num_in):
        x_p = jnp.pad(x_p, ((0, Mp - B), (0, Kp - num_in)))

    # --- grid ordering: shard the larger parallel axis across v7x's 2 TCs ----
    if gn > gm:
        grid = (gn, gm, gk)
        x_map = lambda j, i, k: (i, k)
        w_map = lambda j, i, k: (k, j)
        o_map = lambda j, i, k: (i, j)
    else:
        grid = (gm, gn, gk)
        x_map = lambda i, j, k: (i, k)
        w_map = lambda i, j, k: (k, j)
        o_map = lambda i, j, k: (i, j)

    # --- VMEM budget (generation-aware cap) ----------------------------------
    vmem_bytes = (
        2 * tm * tk * in_bytes                  # double-buffered x tile
        + weight_buffers * tk * tn * in_bytes   # weight tile buffers
        + 2 * tm * tn * out_bytes               # double-buffered out tile
        + tm * tn * 4                           # f32 accumulator
    )
    vmem_limit = int(min(_vmem_cap_bytes(), max(vmem_bytes * 3 // 2, 8 << 20)))

    # Bytes include cross-tile re-reads: x is re-read gn times, W gm times.
    cost = pl.CostEstimate(
        flops=2 * Mp * Np * Kp,
        transcendentals=0,
        bytes_accessed=(Mp * Kp * gn + Kp * Np * gm) * in_bytes
        + Mp * Np * out_bytes,
    )

    if weight_buffers != 2:
        w_spec = pl.BlockSpec((tk, tn), w_map,
                              pipeline_mode=pl.Buffered(weight_buffers))
    else:
        w_spec = pl.BlockSpec((tk, tn), w_map)

    y_p = pl.pallas_call(
        functools.partial(_linear_kernel, precision=precision),
        out_shape=jax.ShapeDtypeStruct((Mp, Np), out_dtype),
        grid_spec=pltpu.PrefetchScalarGridSpec(
            num_scalar_prefetch=0,
            grid=grid,
            in_specs=[pl.BlockSpec((tm, tk), x_map), w_spec],
            out_specs=pl.BlockSpec((tm, tn), o_map),
            scratch_shapes=[pltpu.VMEM((tm, tn), jnp.float32)],
        ),
        compiler_params=pltpu.CompilerParams(
            dimension_semantics=("parallel", "parallel", "arbitrary"),
            vmem_limit_bytes=vmem_limit,
        ),
        cost_estimate=cost,
    )(x_p, w_p)

    if (Mp, Np) != (B, num_out):
        y_p = y_p[:B, :num_out]
    return y_p


class PallasLinear:
    """y = x @ W.T (torch.nn.Linear, bias=False) with the weight prep hoisted.

    The transpose [num_out, num_in] -> [num_in, num_out], cast to the compute
    dtype and 128-alignment padding happen ONCE here, so repeated forwards only
    stream the weight through the kernel (no extra per-call HBM pass)."""

    def __init__(self, weight, *, compute_dtype=jnp.bfloat16, weight_buffers=2):
        weight = jnp.asarray(weight)
        self.num_out, self.num_in = weight.shape
        self.compute_dtype = jnp.dtype(compute_dtype)
        self.weight_buffers = int(weight_buffers)
        Kp = _round_up(self.num_in, 128)
        Np = _round_up(self.num_out, 128)
        w_t = weight.T.astype(self.compute_dtype)
        self.w_prepared = jnp.pad(
            w_t, ((0, Kp - self.num_in), (0, Np - self.num_out))
        )
        # TODO(synk): optional fp8(e4m3) weight path for v7x (halves weight HBM
        # traffic; v7x MXU has no int path) is not implemented here.

    def __call__(self, x, *, out_dtype=None, precision=None):
        out_dtype = x.dtype if out_dtype is None else out_dtype
        if precision is None and self.compute_dtype == jnp.dtype(jnp.float32):
            # Exact-f32 semantics when the caller explicitly asks for f32 operands.
            precision = jax.lax.Precision.HIGHEST
        return _padded_linear_matmul(
            x, self.w_prepared, self.num_out,
            out_dtype=out_dtype, precision=precision,
            weight_buffers=self.weight_buffers,
        )


def linear_forward(x, weight, *, compute_dtype=jnp.bfloat16, precision=None,
                   weight_buffers=2):
    """One-shot y = x @ weight.T (PyTorch nn.Linear layout, no bias).

    For repeated calls with the same weight prefer `PallasLinear`, which hoists
    the transpose/cast/pad out of the forward path."""
    layer = PallasLinear(weight, compute_dtype=compute_dtype,
                         weight_buffers=weight_buffers)
    return layer(x, precision=precision)


def init_linear_weight(key, num_in: int, num_out: int, dtype=jnp.float32):
    """nn.Linear default init: U(-1/sqrt(num_in), 1/sqrt(num_in))."""
    bound = 1.0 / (num_in ** 0.5)
    return jax.random.uniform(
        key, (num_out, num_in), dtype=dtype, minval=-bound, maxval=bound
    )


if __name__ == "__main__":
    # Small shapes consistent with the module: batch=8, num_in=32, num_out=16.
    B, NUM_IN, NUM_OUT = 8, 32, 16

    key = jax.random.PRNGKey(0)
    kx, kw = jax.random.split(key)

    x = jax.random.normal(kx, (B, NUM_IN), dtype=jnp.float32)
    w = init_linear_weight(kw, NUM_IN, NUM_OUT, dtype=jnp.float32)
    y_ref = x @ w.T

    # Default path: bf16 operands / f32 accumulation, weight prepared once and
    # reused across calls.
    layer = PallasLinear(w)
    y = jax.block_until_ready(layer(x))
    assert y.shape == (B, NUM_OUT) and y.dtype == x.dtype
    assert jnp.allclose(y, y_ref, atol=5e-2, rtol=5e-2)
    y2 = jax.block_until_ready(layer(x))          # reuse of prepared weight
    assert jnp.allclose(y2, y, atol=0, rtol=0)

    # Explicit f32-operand path (HIGHEST MXU precision): exact vs f32 reference.
    layer_f32 = PallasLinear(w, compute_dtype=jnp.float32)
    y32 = jax.block_until_ready(layer_f32(x))
    assert y32.shape == (B, NUM_OUT)
    assert jnp.allclose(y32, y_ref, atol=1e-5, rtol=1e-5)

    # One-shot functional wrapper.
    y_fn = jax.block_until_ready(linear_forward(x, w, compute_dtype=jnp.float32))
    assert jnp.allclose(y_fn, y_ref, atol=1e-5, rtol=1e-5)

    # TODO(synk): randomize/post/_post/correction/aggregate_grad/update are
    # training-time autograd/optimizer helpers (torch.autograd.grad w.r.t. the
    # weight), not part of the forward hot path; they are not kernelized here.

    print("KERNEL_OK")
</pallas_src>

<mosaic_0001>
module attributes {stable_mosaic.version = 11 : i64} {
  func.func @_linear_kernel(%arg0: i32, %arg1: i32, %arg2: i32, %arg3: memref<16x128xbf16, #tpu.memory_space<vmem>>, %arg4: memref<128x128xbf16, #tpu.memory_space<vmem>>, %arg5: memref<16x128xf32, #tpu.memory_space<vmem>>, %arg6: memref<16x128xf32, #tpu.memory_space<vmem>>) attributes {dimension_semantics = [#tpu.dimension_semantics<parallel>, #tpu.dimension_semantics<parallel>, #tpu.dimension_semantics<arbitrary>], iteration_bounds = array<i64: 1, 1, 1>, scalar_prefetch = 0 : i64, scratch_operands = 1 : i64, tpu.core_type = #tpu.core_type<tc>, window_params = [{transform_indices = @transform_0, window_bounds = array<i64: 16, 128>}, {transform_indices = @transform_1, window_bounds = array<i64: 128, 128>}, {transform_indices = @transform_2, window_bounds = array<i64: 16, 128>}]} {
    %c0 = arith.constant 0 : index
    %c0_0 = arith.constant 0 : index
    %0 = vector.load %arg3[%c0, %c0_0] : memref<16x128xbf16, #tpu.memory_space<vmem>>, vector<16x128xbf16>
    %c0_1 = arith.constant 0 : index
    %c0_2 = arith.constant 0 : index
    %1 = vector.load %arg4[%c0_1, %c0_2] : memref<128x128xbf16, #tpu.memory_space<vmem>>, vector<128x128xbf16>
    %cst = arith.constant dense<0.000000e+00> : vector<16x128xf32>
    %2 = tpu.matmul %0, %1, %cst {dimension_numbers = #tpu.dot_dimension_numbers<[1], [0], [0], [1], [0, 0, 1, 1], [], []>} : vector<16x128xbf16>, vector<128x128xbf16>, vector<16x128xf32> -> vector<16x128xf32>
    %c0_i32 = arith.constant 0 : i32
    %3 = arith.cmpi eq, %arg2, %c0_i32 : i32
    %4 = arith.extui %3 : i1 to i32
    %c0_i32_3 = arith.constant 0 : i32
    %5 = arith.cmpi ne, %4, %c0_i32_3 : i32
    scf.if %5 {
      %c0_8 = arith.constant 0 : index
      %c0_9 = arith.constant 0 : index
      %12 = vector.load %arg6[%c0_8, %c0_9] : memref<16x128xf32, #tpu.memory_space<vmem>>, vector<16x128xf32>
      tpu.vector_store %arg6[%c0_8, %c0_9], %2 {strides = array<i32>} : memref<16x128xf32, #tpu.memory_space<vmem>>, vector<16x128xf32>,
    } else {
    }
    %c0_i32_4 = arith.constant 0 : i32
    %6 = arith.cmpi sgt, %arg2, %c0_i32_4 : i32
    %7 = arith.extui %6 : i1 to i32
    %c0_i32_5 = arith.constant 0 : i32
    %8 = arith.cmpi ne, %7, %c0_i32_5 : i32
    scf.if %8 {
      %c0_8 = arith.constant 0 : index
      %c0_9 = arith.constant 0 : index
      %12 = vector.load %arg6[%c0_8, %c0_9] : memref<16x128xf32, #tpu.memory_space<vmem>>, vector<16x128xf32>
      %13 = arith.addf %12, %2 : vector<16x128xf32>
      %c0_10 = arith.constant 0 : index
      %c0_11 = arith.constant 0 : index
      %14 = vector.load %arg6[%c0_10, %c0_11] : memref<16x128xf32, #tpu.memory_space<vmem>>, vector<16x128xf32>
      tpu.vector_store %arg6[%c0_10, %c0_11], %13 {strides = array<i32>} : memref<16x128xf32, #tpu.memory_space<vmem>>, vector<16x128xf32>,
    } else {
    }
    %c0_i32_6 = arith.constant 0 : i32
    %9 = arith.cmpi eq, %arg2, %c0_i32_6 : i32
    %10 = arith.extui %9 : i1 to i32
    %c0_i32_7 = arith.constant 0 : i32
    %11 = arith.cmpi ne, %10, %c0_i32_7 : i32
    scf.if %11 {
      %c0_8 = arith.constant 0 : index
      %c0_9 = arith.constant 0 : index
      %12 = vector.load %arg6[%c0_8, %c0_9] : memref<16x128xf32, #tpu.memory_space<vmem>>, vector<16x128xf32>
      %c0_10 = arith.constant 0 : index
      %c0_11 = arith.constant 0 : index
      %13 = vector.load %arg5[%c0_10, %c0_11] : memref<16x128xf32, #tpu.memory_space<vmem>>, vector<16x128xf32>
      tpu.vector_store %arg5[%c0_10, %c0_11], %12 {strides = array<i32>} : memref<16x128xf32, #tpu.memory_space<vmem>>, vector<16x128xf32>,
    } else {
    }
    return
  }
  func.func @transform_0(%arg0: i32, %arg1: i32, %arg2: i32) -> (i32, i32) {
    %c0_i32 = arith.constant 0 : i32
    return %arg0, %arg2 : i32, i32
  }
  func.func @transform_1(%arg0: i32, %arg1: i32, %arg2: i32) -> (i32, i32) {
    %c0_i32 = arith.constant 0 : i32
    return %arg2, %arg1 : i32, i32
  }
  func.func @transform_2(%arg0: i32, %arg1: i32, %arg2: i32) -> (i32, i32) {
    %c0_i32 = arith.constant 0 : i32
    return %arg0, %arg1 : i32, i32
  }
}

</mosaic_0001>

<bundles_post_ra>
// kernel: tpu_custom_call.1
= control target key start
LH: loop header
LB: loop body
LE: loop exit
PB: predicated region body
PF: predicated region fallthrough
CT: control target
= control target key end

     0   :  { %7 = vsyncpa [#allocation4], 0  ;;  %s383_s0 = inlined_call_operand.hbm [shape: bf16[16,128], index: 0, kind: input, shape index: {}]   ;;  %s384_s1 = inlined_call_operand.hbm [shape: bf16[128,128], index: 1, kind: input, shape index: {}]   ;;  %s385_s2 = inlined_call_operand.hbm [shape: f32[16,128], index: 2, kind: output, shape index: {}]  }
   0x1   :  { %8 = vsyncpa [#allocation7], 0 }
   0x2   :  { %9 = vsyncpa [#allocation5], 0  ;;  %s323_s9 = smov [#allocation3]   ;;  %s251_s13 = scalar_lea.hbm %s383_s0, 128 }
   0x3   :  { %s15_s10 = sshll.u32 %s323_s9, 4  ;;  %p252_p0 = scmp.ne.s32.totalorder %s383_s0, %s251_s13  ;;  %s16_s10 = int_to_ptr.vmem [resolvable:$true] %s15_s10 }
   0x4   :  { %p255_p1 = scmp.lt.u32.totalorder %s251_s13, %s383_s0 }
   0x6   :  { %p257_p2 = pnand %p255_p1, %p252_p0 }
   0x8   :  { %260 = shalt.err (!%p257_p2)
}
   0x9   :  { %s261_s18 = scalar_lea.vmem %s16_s10, 128  ;;  %p266_p4 = scmp.lt.s32.totalorder %s16_s10, %s16_s10 }
   0xa   :  { %p262_p3 = scmp.ne.s32.totalorder %s16_s10, %s261_s18  ;;  %p267_p5 = scmp.lt.s32.totalorder %s261_s18, %s261_s18 }
   0xc   :  { %p268_p6 = por %p267_p5, %p266_p4 }
   0xe   :  { %p269_p7 = pnand %p268_p6, %p262_p3 }
  0x10   :  { %272 = shalt.err (!%p269_p7)
}
  0x11   :  { %s324_s19 = smov 64   ;;  %s325_s20 = smov 4  }
  0x12   :  { %21 = dma.hbm_to_vmem [thread:$0]  %s383_s0, 128, %s16_s10, [#allocation4], %s324_s19, %s324_s19, %s325_s20  }
  0x13   :  { %s326_s23 = smov [#allocation6]   ;;  %s273_s27 = scalar_lea.hbm %s384_s1, 1024 }
  0x14   :  { %s27_s24 = sshll.u32 %s326_s23, 4  ;;  %p274_p8 = scmp.ne.s32.totalorder %s384_s1, %s273_s27  ;;  %s28_s24 = int_to_ptr.vmem [resolvable:$true] %s27_s24 }
  0x15   :  { %p277_p9 = scmp.lt.u32.totalorder %s273_s27, %s384_s1 }
  0x17   :  { %p279_p10 = pnand %p277_p9, %p274_p8 }
  0x19   :  { %282 = shalt.err (!%p279_p10)
}
  0x1a   :  { %s283_s4 = scalar_lea.vmem %s28_s24, 1024  ;;  %p288_p12 = scmp.lt.s32.totalorder %s28_s24, %s28_s24 }
  0x1b   :  { %p284_p11 = scmp.ne.s32.totalorder %s28_s24, %s283_s4  ;;  %p289_p13 = scmp.lt.s32.totalorder %s283_s4, %s283_s4 }
  0x1d   :  { %p290_p0 = por %p289_p13, %p288_p12 }
  0x1f   :  { %p291_p1 = pnand %p290_p0, %p284_p11 }
  0x21   :  { %294 = shalt.err (!%p291_p1)
}
  0x22   :  { %33 = dma.hbm_to_vmem [thread:$0]  %s384_s1, 1024, %s28_s24, [#allocation7], %s324_s19, %s324_s19, %s325_s20  }
  0x23   :  { %317 = dma.done.wait [#allocation4], 128  }
  0x24   :  { %318 = vsyncadd [#allocation4], 4294967168 }
  0x25   :  { %319 = dma.done.wait [#allocation7], 1024  }
  0x26   :  { %320 = vsyncadd [#allocation7], 4294966272  ;;  %v327_v0 = vmov 0.0   ;;  %vm328_vm0 = vmmov 0   ;;  %v242_v1 = vld [vmem:[#allocation6] sm:$0xff]   ;;  %v243_v2 = vld [vmem:[#allocation6 + $0x8] sm:$0xff]  }
  0x27   :  { %213 = vmatprep.subr.bf16.mxu0 %v327_v0  ;;  %229 = vmatprep.mubr.msk.bf16.mxu0 %vm328_vm0, %v327_v0  ;;  %v244_v3 = vld [vmem:[#allocation6 + $0x10] sm:$0xff]   ;;  %v245_v4 = vld [vmem:[#allocation6 + $0x18] sm:$0xff]   ;;  %v246_v5 = vld [vmem:[#allocation6 + $0x20] sm:$0xff]   ;;  %s329_s1 = smov [#allocation8]  }
  0x28   :  { %214 = vmatpush3.bf16.msra.mxu0 %v242_v1  ;;  %v247_v6 = vld [vmem:[#allocation6 + $0x28] sm:$0xff]   ;;  %v248_v7 = vld [vmem:[#allocation6 + $0x30] sm:$0xff]   ;;  %v249_v8 = vld [vmem:[#allocation6 + $0x38] sm:$0xff]   ;;  %s182_s6 = sshll.u32 %s329_s1, 4  ;;  %s183_s6 = int_to_ptr.vmem [resolvable:$true] %s182_s6 }
  0x29   :  { %215 = vmatprep.subr.bf16.mxu0 %v327_v0  ;;  %v250_v9 = vld [vmem:[#allocation3] sm:$0xff]   ;;  %s295_s7 = scalar_lea.vmem %s183_s6, 256  ;;  %p300_p3 = scmp.lt.s32.totalorder %s183_s6, %s183_s6 }
  0x2a   :  { %p296_p2 = scmp.ne.s32.totalorder %s183_s6, %s295_s7  ;;  %p301_p4 = scmp.lt.s32.totalorder %s295_s7, %s295_s7 }
  0x2c   :  { %216 = vmatpush3.bf16.msra.mxu0 %v243_v2  ;;  %p302_p5 = por %p301_p4, %p300_p3 }
  0x2d   :  { %217 = vmatprep.subr.bf16.mxu0 %v327_v0 }
  0x2e   :  { %p303_p6 = pnand %p302_p5, %p296_p2 }
  0x30   :  { %218 = vmatpush3.bf16.msra.mxu0 %v244_v3 }
  0x31   :  { %219 = vmatprep.subr.bf16.mxu0 %v327_v0 }
  0x34   :  { %220 = vmatpush3.bf16.msra.mxu0 %v245_v4 }
  0x35   :  { %221 = vmatprep.subr.bf16.mxu0 %v327_v0 }
  0x38   :  { %222 = vmatpush3.bf16.msra.mxu0 %v246_v5 }
  0x39   :  { %223 = vmatprep.subr.bf16.mxu0 %v327_v0 }
  0x3c   :  { %224 = vmatpush3.bf16.msra.mxu0 %v247_v6 }
  0x3d   :  { %225 = vmatprep.subr.bf16.mxu0 %v327_v0 }
  0x40   :  { %226 = vmatpush3.bf16.msra.mxu0 %v248_v7 }
  0x41   :  { %227 = vmatprep.subr.bf16.mxu0 %v327_v0 }
  0x44   :  { %228 = vmatpush3.bf16.msra.mxu0 %v249_v8 }
  0x47   :  { %230 = vmatmul.mubr.bf16.vlgmr.msra.gmra.mrb[0].mxu0 %v250_v9 }
 0x11a   :  { %v147_v10 = vpop.f32.mrb[0].mxu0 }
 0x11b   :  { %175 = vst [vmem:[#allocation8] sm:$0xff] %v147_v10  ;;  %v231_v11 = vpop.f32.mrb[1].mxu0 }
 0x11c   :  { %v150_v12 = vpop.f32.mrb[2].mxu0 }
 0x11d   :  { %176 = vst [vmem:[#allocation8 + $0x8] sm:$0xff] %v150_v12  ;;  %v232_v13 = vpop.f32.mrb[3].mxu0 }
 0x11e   :  { %306 = shalt.err (!%p303_p6)
}
 0x11f   :  { %s307_s10 = scalar_lea.hbm %s385_s2, 256 }
 0x120   :  { %p308_p7 = scmp.ne.s32.totalorder %s385_s2, %s307_s10  ;;  %p311_p8 = scmp.lt.u32.totalorder %s307_s10, %s385_s2 }
 0x122   :  { %p313_p9 = pnand %p311_p8, %p308_p7 }
 0x124   :  { %316 = shalt.err (!%p313_p9)
}
 0x125   :  { %s330_s15 = smov 128   ;;  %s331_s16 = smov 8  }
 0x126   :  { %188 = dma.vmem_to_hbm [thread:$0]  %s183_s6, 256, %s385_s2, [#allocation5], %s330_s15, %s330_s15, %s331_s16  }
 0x127   :  { %321 = dma.done.wait [#allocation5], 256  }
 0x128   :  { %322 = vsyncadd [#allocation5], 4294967040 }
 0x129   :  { %192 = vsyncpa [#allocation4], 1 }
 0x12a   :  { %193 = vsyncpa [#allocation7], 1 }
 0x12b   :  { %194 = vsyncpa [#allocation5], 1 }

</bundles_post_ra>
